<compile_context>
chip_gen: v5e
topology: v5e:2x2
jax: 0.10.0
libtpu: 0.0.40
codegen_flags: <defaults>
</compile_context>

<pallas_src>
import functools

import jax
import jax.numpy as jnp
from jax.experimental import pallas as pl
from jax.experimental.pallas import tpu as pltpu

CH = 16        # `channels` in the torch module
CA = CH + 1    # channels on the attention / prediction path (17)
GRP = 8        # instances per grid step (sublane-dense blocks)

# tap order (dh, dw) for a 3x3 / padding=1 conv; index 4 is the centre tap.
_TAPS = tuple((dh, dw) for dh in (-1, 0, 1) for dw in (-1, 0, 1))


# ---------------------------------------------------------------------------
# Shared helper: 3x3 padding=1 conv in (Cin, HW) layout as 9 accumulating
# per-tap MXU dots.  No (9*Cin, HW) im2col tensor is ever materialized.
#   x      : (Cin, HW) f32
#   w_taps : (9, Cout, Cin) bf16
#   masks  : (8, HW) f32 precomputed border masks (centre tap skipped)
# ---------------------------------------------------------------------------
def _conv3x3_taps(x, w_taps, masks, W):
    HW = x.shape[-1]
    acc = None
    for t, (dh, dw) in enumerate(_TAPS):
        s = dh * W + dw
        if s == 0:
            tap = x
        else:
            m = t if t < 4 else t - 1
            tap = pltpu.roll(x, shift=(-s) % HW, axis=1) * masks[m:m + 1, :]
        y = jnp.dot(w_taps[t], tap.astype(jnp.bfloat16),
                    preferred_element_type=jnp.float32)
        acc = y if acc is None else acc + y
    return acc                                                   # (Cout, HW) f32


# ---------------------------------------------------------------------------
# Kernel 1: image_conv = conv3x3(3->16) + folded BN + ReLU, one image per step.
# ---------------------------------------------------------------------------
def _image_conv_kernel(img_ref, w_ref, p_ref, masks_ref, o_ref, *, W):
    x = img_ref[0]                                               # (3, HW) f32
    y = _conv3x3_taps(x, w_ref[...], masks_ref[...], W)          # (16, HW) f32
    p = p_ref[...]                                               # (16, 2)
    o_ref[0] = jnp.maximum(y * p[:, 0:1] + p[:, 1:2], 0.0)


def image_conv(imgs_flat, w_taps, p_img, masks, H, W):
    B = imgs_flat.shape[0]
    HW = H * W
    kern = functools.partial(_image_conv_kernel, W=W)
    return pl.pallas_call(
        kern,
        out_shape=jax.ShapeDtypeStruct((B, CH, HW), jnp.float32),
        grid=(B,),
        in_specs=[
            pl.BlockSpec((1, 3, HW), lambda b: (b, 0, 0)),
            pl.BlockSpec((9, CH, 3), lambda b: (0, 0, 0)),
            pl.BlockSpec((CH, 2), lambda b: (0, 0)),
            pl.BlockSpec((8, HW), lambda b: (0, 0)),
        ],
        out_specs=pl.BlockSpec((1, CH, HW), lambda b: (b, 0, 0)),
        compiler_params=pltpu.CompilerParams(
            dimension_semantics=("parallel",),
            vmem_limit_bytes=48 * 1024 * 1024),
    )(imgs_flat, w_taps, p_img, masks)


# ---------------------------------------------------------------------------
# Kernel 2 (fused): sigmoid gating + concat + CBA attention + prediction head,
# GRP instances per grid step (all instances of all levels batched together).
# Per instance:
#   b   = [ins ; feat*sigmoid(ins)]              (17, HW)  == all_features
#   c   = sigmoid(b b^T)                         (17, 17)
#   att = (c b) * b                              (17, HW)  == cba output
#   y   = relu(conv3x3(att) * s1 + b1)           (17, HW)
#   out = sum_c(y * w2) + b2                     (1,  HW)
# ---------------------------------------------------------------------------
def _cba_prediction_kernel(img_ids_ref, ins_ref, feat_ref, masks_ref, w1_ref,
                           p_ref, o_ref, *, W):
    del img_ids_ref                           # consumed by the index_maps only
    feat = feat_ref[0]                        # (16, HW) f32, shared by the block
    masks = masks_ref[...]                    # (8, HW)  f32, resident
    w1 = w1_ref[...]                          # (9, 17, 17) bf16
    p = p_ref[...]                            # (17, 4)  packed s1|b1|w2|b2
    s1, b1, w2 = p[:, 0:1], p[:, 1:2], p[:, 2:3]
    b2 = p[0:1, 3:4]

    def body(i, carry):
        ins = ins_ref[pl.ds(i, 1), :]                            # (1, HW)
        fine = feat * jax.nn.sigmoid(ins)                        # (16, HW)
        b = jnp.concatenate([ins, fine], axis=0)                 # (17, HW) f32
        b_bf = b.astype(jnp.bfloat16)
        gram = jax.lax.dot_general(b_bf, b_bf, (((1,), (1,)), ((), ())),
                                   preferred_element_type=jnp.float32)  # (17,17)
        c = jax.nn.sigmoid(gram)
        att = jnp.dot(c.astype(jnp.bfloat16), b_bf,
                      preferred_element_type=jnp.float32) * b            # (17,HW)
        y = _conv3x3_taps(att, w1, masks, W)                             # (17,HW)
        y = jnp.maximum(y * s1 + b1, 0.0)
        # 1x1 conv 17->1: VPU multiply + sublane reduction.
        o_ref[pl.ds(i, 1), :] = jnp.sum(y * w2, axis=0, keepdims=True) + b2
        return carry

    jax.lax.fori_loop(0, GRP, body, 0, unroll=True)


def cba_prediction(img_ids, ins_all, feats, masks, w1_taps, pvec, H, W):
    N = ins_all.shape[0]                                   # multiple of GRP
    HW = H * W
    kern = functools.partial(_cba_prediction_kernel, W=W)
    grid_spec = pltpu.PrefetchScalarGridSpec(
        num_scalar_prefetch=1,
        grid=(N // GRP,),
        in_specs=[
            pl.BlockSpec((GRP, HW), lambda n, ids: (n, 0)),
            pl.BlockSpec((1, CH, HW), lambda n, ids: (ids[n], 0, 0)),
            pl.BlockSpec((8, HW), lambda n, ids: (0, 0)),
            pl.BlockSpec((9, CA, CA), lambda n, ids: (0, 0, 0)),
            pl.BlockSpec((CA, 4), lambda n, ids: (0, 0)),
        ],
        out_specs=pl.BlockSpec((GRP, HW), lambda n, ids: (n, 0)),
    )
    return pl.pallas_call(
        kern,
        out_shape=jax.ShapeDtypeStruct((N, HW), jnp.float32),
        grid_spec=grid_spec,
        compiler_params=pltpu.CompilerParams(
            dimension_semantics=("parallel",),
            vmem_limit_bytes=48 * 1024 * 1024),
    )(img_ids, ins_all, feats, masks, w1_taps, pvec)


# ---------------------------------------------------------------------------
# Glue: parameters, BN folding, weight repacking, masks, bilinear resize
# ---------------------------------------------------------------------------
def init_params(key):
    k1, k2, k3 = jax.random.split(key, 3)
    std = 0.01
    return {
        # image_conv: Conv2d(3, 16, 3, padding=1) + BN(16) + ReLU
        "w_img": jax.random.normal(k1, (CH, 3, 3, 3), jnp.float32) * std,
        "b_img": jnp.zeros((CH,), jnp.float32),
        "bn_img": dict(gamma=jnp.ones((CH,), jnp.float32), beta=jnp.zeros((CH,), jnp.float32),
                       mean=jnp.zeros((CH,), jnp.float32), var=jnp.ones((CH,), jnp.float32)),
        # prediction: Conv2d(17, 17, 3, padding=1) + BN(17) + ReLU + Conv2d(17, 1, 1)
        "w_pred1": jax.random.normal(k2, (CA, CA, 3, 3), jnp.float32) * std,
        "b_pred1": jnp.zeros((CA,), jnp.float32),
        "bn_pred": dict(gamma=jnp.ones((CA,), jnp.float32), beta=jnp.zeros((CA,), jnp.float32),
                        mean=jnp.zeros((CA,), jnp.float32), var=jnp.ones((CA,), jnp.float32)),
        "w_pred2": jax.random.normal(k3, (1, CA, 1, 1), jnp.float32) * std,
        "b_pred2": jnp.zeros((1,), jnp.float32),
    }


def _conv3x3_to_taps(w):
    # torch layout (Cout, Cin, kh, kw) -> (9, Cout, Cin), tap t = kh*3 + kw
    cout, cin = w.shape[:2]
    return jnp.transpose(w, (2, 3, 0, 1)).reshape(9, cout, cin)


def _fold_bn(conv_bias, bn, eps=1e-5):
    scale = bn["gamma"] / jnp.sqrt(bn["var"] + eps)
    bias = (conv_bias - bn["mean"]) * scale + bn["beta"]
    return scale[:, None], bias[:, None]            # (C, 1) columns for (C, HW)


def _border_masks(H, W):
    """Precomputed validity masks for the 8 non-centre 3x3 taps, (8, HW) f32."""
    hw = jnp.arange(H * W, dtype=jnp.int32)
    h = hw // W
    w = hw - h * W
    rows = []
    for dh, dw in _TAPS:
        if dh == 0 and dw == 0:
            continue
        rows.append((h + dh >= 0) & (h + dh < H) & (w + dw >= 0) & (w + dw < W))
    return jnp.stack(rows, axis=0).astype(jnp.float32)


def resize_bilinear_align_corners(x, out_h, out_w):
    # x: (B, C, H0, W0) -> (B, C, out_h, out_w); F.interpolate(..., align_corners=True)
    B, C, H0, W0 = x.shape
    ys = jnp.zeros((out_h,), jnp.float32) if out_h == 1 else jnp.linspace(0.0, H0 - 1.0, out_h)
    xs = jnp.zeros((out_w,), jnp.float32) if out_w == 1 else jnp.linspace(0.0, W0 - 1.0, out_w)
    y0 = jnp.floor(ys).astype(jnp.int32)
    x0 = jnp.floor(xs).astype(jnp.int32)
    y1 = jnp.minimum(y0 + 1, H0 - 1)
    x1 = jnp.minimum(x0 + 1, W0 - 1)
    wy = (ys - y0.astype(jnp.float32))[None, None, :, None]
    wx = (xs - x0.astype(jnp.float32))[None, None, None, :]
    top, bot = x[:, :, y0, :], x[:, :, y1, :]
    tl, tr = top[:, :, :, x0], top[:, :, :, x1]
    bl, br = bot[:, :, :, x0], bot[:, :, :, x1]
    t = tl * (1.0 - wx) + tr * wx
    b = bl * (1.0 - wx) + br * wx
    return t * (1.0 - wy) + b * wy


def boundary_enhancement_forward(ins_pred_list, original_images, params):
    H = W = 0
    for ins in ins_pred_list:
        if ins is not None:
            H, W = ins.shape[-2:]
    assert H > 0 and W > 0, "error error"
    HW = H * W
    B = original_images.shape[0]

    # TODO(synk): align_corners bilinear resize stays plain-JAX glue (gather-heavy, not the hot path).
    imgs = resize_bilinear_align_corners(original_images.astype(jnp.float32), H, W)
    imgs_flat = imgs.reshape(B, 3, HW)

    masks = _border_masks(H, W)                                  # (8, HW) resident
    s_img, b_img = _fold_bn(params["b_img"], params["bn_img"])
    p_img = jnp.concatenate([s_img, b_img], axis=1)              # (16, 2)
    w_img_taps = _conv3x3_to_taps(params["w_img"]).astype(jnp.bfloat16)
    feats = image_conv(imgs_flat, w_img_taps, p_img, masks, H, W)

    # Batch every instance of every non-None list entry into one pallas_call.
    # Pad each entry to a multiple of GRP so all instances in a grid block
    # share one image id (used by the scalar-prefetch feat index_map).
    chunks, ids, counts = [], [], []
    for idx, ins_pred in enumerate(ins_pred_list):
        if ins_pred is None:
            continue
        assert ins_pred.shape[-2:] == (H, W)
        n = ins_pred.shape[0]
        n_pad = pl.cdiv(n, GRP) * GRP
        x = ins_pred.astype(jnp.float32).reshape(n, HW)
        if n_pad != n:
            x = jnp.concatenate([x, jnp.zeros((n_pad - n, HW), jnp.float32)], 0)
        chunks.append(x)
        ids.append(jnp.full((n_pad // GRP,), idx, jnp.int32))
        counts.append((n, n_pad))
    if not chunks:
        return []
    ins_all = jnp.concatenate(chunks, axis=0)                    # (N_pad, HW)
    img_ids = jnp.concatenate(ids, axis=0)                       # (N_pad // GRP,)

    s_p, b_p = _fold_bn(params["b_pred1"], params["bn_pred"])
    w1_taps = _conv3x3_to_taps(params["w_pred1"]).astype(jnp.bfloat16)   # (9,17,17)
    w2_col = params["w_pred2"].reshape(1, CA).T                          # (17, 1)
    b2_col = jnp.full((CA, 1), params["b_pred2"][0], jnp.float32)
    pvec = jnp.concatenate([s_p, b_p, w2_col, b2_col], axis=1)           # (17, 4)

    pred = cba_prediction(img_ids, ins_all, feats, masks, w1_taps, pvec, H, W)

    outs, off = [], 0
    for n, n_pad in counts:
        outs.append(pred[off:off + n].reshape(n, H, W))
        off += n_pad
    return outs


if __name__ == "__main__":
    key = jax.random.PRNGKey(0)
    kp, ki, ka, kb = jax.random.split(key, 4)
    params = init_params(kp)

    B, H, W = 3, 16, 16
    original_images = jax.random.normal(ki, (B, 3, 24, 24), jnp.float32)
    ins_pred_list = [
        jax.random.normal(ka, (3, H, W), jnp.float32),  # image 0: 3 instance preds
        None,                                           # image 1: skipped (matches torch loop)
        jax.random.normal(kb, (4, H, W), jnp.float32),  # image 2: 4 instance preds
    ]

    outs = boundary_enhancement_forward(ins_pred_list, original_images, params)
    for o in outs:
        jax.block_until_ready(o)
    assert outs[0].shape == (3, H, W) and outs[1].shape == (4, H, W)
    print("KERNEL_OK")
</pallas_src>

<mosaic_0001>
module attributes {stable_mosaic.version = 11 : i64} {
  func.func @_image_conv_kernel(%arg0: i32, %arg1: memref<1x3x256xf32, #tpu.memory_space<vmem>>, %arg2: memref<9x16x3xbf16, #tpu.memory_space<vmem>>, %arg3: memref<16x2xf32, #tpu.memory_space<vmem>>, %arg4: memref<8x256xf32, #tpu.memory_space<vmem>>, %arg5: memref<1x16x256xf32, #tpu.memory_space<vmem>>) attributes {dimension_semantics = [#tpu.dimension_semantics<parallel>], iteration_bounds = array<i64: 3>, scalar_prefetch = 0 : i64, scratch_operands = 0 : i64, tpu.core_type = #tpu.core_type<tc>, window_params = [{transform_indices = @transform_0, window_bounds = array<i64: 1, 3, 256>}, {pipeline_mode = #tpu.pipeline_mode<synchronous>, transform_indices = @transform_1, window_bounds = array<i64: 9, 16, 3>}, {pipeline_mode = #tpu.pipeline_mode<synchronous>, transform_indices = @transform_2, window_bounds = array<i64: 16, 2>}, {pipeline_mode = #tpu.pipeline_mode<synchronous>, transform_indices = @transform_3, window_bounds = array<i64: 8, 256>}, {transform_indices = @transform_4, window_bounds = array<i64: 1, 16, 256>}]} {
    %c0 = arith.constant 0 : index
    %c0_0 = arith.constant 0 : index
    %c0_1 = arith.constant 0 : index
    %0 = vector.load %arg1[%c0, %c0_0, %c0_1] : memref<1x3x256xf32, #tpu.memory_space<vmem>>, vector<1x3x256xf32>
    %1 = vector.shape_cast %0 : vector<1x3x256xf32> to vector<3x256xf32>
    %c0_2 = arith.constant 0 : index
    %c0_3 = arith.constant 0 : index
    %c0_4 = arith.constant 0 : index
    %2 = vector.load %arg2[%c0_2, %c0_3, %c0_4] : memref<9x16x3xbf16, #tpu.memory_space<vmem>>, vector<9x16x3xbf16>
    %c0_5 = arith.constant 0 : index
    %c0_6 = arith.constant 0 : index
    %3 = vector.load %arg4[%c0_5, %c0_6] : memref<8x256xf32, #tpu.memory_space<vmem>>, vector<8x256xf32>
    %c17_i32 = arith.constant 17 : i32
    %4 = tpu.dynamic_rotate %1 by %c17_i32 dim 1 : vector<3x256xf32>, i32 -> vector<3x256xf32>
    %5 = vector.extract_strided_slice %3 {offsets = [0, 0], sizes = [1, 256], strides = [1, 1]} : vector<8x256xf32> to vector<1x256xf32>
    %6 = vector.broadcast %5 : vector<1x256xf32> to vector<3x256xf32>
    %7 = arith.mulf %4, %6 : vector<3x256xf32>
    %8 = vector.extract_strided_slice %2 {offsets = [0, 0, 0], sizes = [1, 16, 3], strides = [1, 1, 1]} : vector<9x16x3xbf16> to vector<1x16x3xbf16>
    %9 = vector.shape_cast %8 : vector<1x16x3xbf16> to vector<16x3xbf16>
    %10 = arith.truncf %7 : vector<3x256xf32> to vector<3x256xbf16>
    %cst = arith.constant dense<0.000000e+00> : vector<16x256xf32>
    %11 = tpu.matmul %9, %10, %cst {dimension_numbers = #tpu.dot_dimension_numbers<[1], [0], [0], [1], [0, 0, 1, 1], [], []>} : vector<16x3xbf16>, vector<3x256xbf16>, vector<16x256xf32> -> vector<16x256xf32>
    %c16_i32 = arith.constant 16 : i32
    %12 = tpu.dynamic_rotate %1 by %c16_i32 dim 1 : vector<3x256xf32>, i32 -> vector<3x256xf32>
    %13 = vector.extract_strided_slice %3 {offsets = [1, 0], sizes = [1, 256], strides = [1, 1]} : vector<8x256xf32> to vector<1x256xf32>
    %14 = vector.broadcast %13 : vector<1x256xf32> to vector<3x256xf32>
    %15 = arith.mulf %12, %14 : vector<3x256xf32>
    %16 = vector.extract_strided_slice %2 {offsets = [1, 0, 0], sizes = [1, 16, 3], strides = [1, 1, 1]} : vector<9x16x3xbf16> to vector<1x16x3xbf16>
    %17 = vector.shape_cast %16 : vector<1x16x3xbf16> to vector<16x3xbf16>
    %18 = arith.truncf %15 : vector<3x256xf32> to vector<3x256xbf16>
    %cst_7 = arith.constant dense<0.000000e+00> : vector<16x256xf32>
    %19 = tpu.matmul %17, %18, %cst_7 {dimension_numbers = #tpu.dot_dimension_numbers<[1], [0], [0], [1], [0, 0, 1, 1], [], []>} : vector<16x3xbf16>, vector<3x256xbf16>, vector<16x256xf32> -> vector<16x256xf32>
    %20 = arith.addf %11, %19 : vector<16x256xf32>
    %c15_i32 = arith.constant 15 : i32
    %21 = tpu.dynamic_rotate %1 by %c15_i32 dim 1 : vector<3x256xf32>, i32 -> vector<3x256xf32>
    %22 = vector.extract_strided_slice %3 {offsets = [2, 0], sizes = [1, 256], strides = [1, 1]} : vector<8x256xf32> to vector<1x256xf32>
    %23 = vector.broadcast %22 : vector<1x256xf32> to vector<3x256xf32>
    %24 = arith.mulf %21, %23 : vector<3x256xf32>
    %25 = vector.extract_strided_slice %2 {offsets = [2, 0, 0], sizes = [1, 16, 3], strides = [1, 1, 1]} : vector<9x16x3xbf16> to vector<1x16x3xbf16>
    %26 = vector.shape_cast %25 : vector<1x16x3xbf16> to vector<16x3xbf16>
    %27 = arith.truncf %24 : vector<3x256xf32> to vector<3x256xbf16>
    %cst_8 = arith.constant dense<0.000000e+00> : vector<16x256xf32>
    %28 = tpu.matmul %26, %27, %cst_8 {dimension_numbers = #tpu.dot_dimension_numbers<[1], [0], [0], [1], [0, 0, 1, 1], [], []>} : vector<16x3xbf16>, vector<3x256xbf16>, vector<16x256xf32> -> vector<16x256xf32>
    %29 = arith.addf %20, %28 : vector<16x256xf32>
    %c1_i32 = arith.constant 1 : i32
    %30 = tpu.dynamic_rotate %1 by %c1_i32 dim 1 : vector<3x256xf32>, i32 -> vector<3x256xf32>
    %31 = vector.extract_strided_slice %3 {offsets = [3, 0], sizes = [1, 256], strides = [1, 1]} : vector<8x256xf32> to vector<1x256xf32>
    %32 = vector.broadcast %31 : vector<1x256xf32> to vector<3x256xf32>
    %33 = arith.mulf %30, %32 : vector<3x256xf32>
    %34 = vector.extract_strided_slice %2 {offsets = [3, 0, 0], sizes = [1, 16, 3], strides = [1, 1, 1]} : vector<9x16x3xbf16> to vector<1x16x3xbf16>
    %35 = vector.shape_cast %34 : vector<1x16x3xbf16> to vector<16x3xbf16>
    %36 = arith.truncf %33 : vector<3x256xf32> to vector<3x256xbf16>
    %cst_9 = arith.constant dense<0.000000e+00> : vector<16x256xf32>
    %37 = tpu.matmul %35, %36, %cst_9 {dimension_numbers = #tpu.dot_dimension_numbers<[1], [0], [0], [1], [0, 0, 1, 1], [], []>} : vector<16x3xbf16>, vector<3x256xbf16>, vector<16x256xf32> -> vector<16x256xf32>
    %38 = arith.addf %29, %37 : vector<16x256xf32>
    %39 = vector.extract_strided_slice %2 {offsets = [4, 0, 0], sizes = [1, 16, 3], strides = [1, 1, 1]} : vector<9x16x3xbf16> to vector<1x16x3xbf16>
    %40 = vector.shape_cast %39 : vector<1x16x3xbf16> to vector<16x3xbf16>
    %41 = arith.truncf %1 : vector<3x256xf32> to vector<3x256xbf16>
    %cst_10 = arith.constant dense<0.000000e+00> : vector<16x256xf32>
    %42 = tpu.matmul %40, %41, %cst_10 {dimension_numbers = #tpu.dot_dimension_numbers<[1], [0], [0], [1], [0, 0, 1, 1], [], []>} : vector<16x3xbf16>, vector<3x256xbf16>, vector<16x256xf32> -> vector<16x256xf32>
    %43 = arith.addf %38, %42 : vector<16x256xf32>
    %c255_i32 = arith.constant 255 : i32
    %44 = tpu.dynamic_rotate %1 by %c255_i32 dim 1 : vector<3x256xf32>, i32 -> vector<3x256xf32>
    %45 = vector.extract_strided_slice %3 {offsets = [4, 0], sizes = [1, 256], strides = [1, 1]} : vector<8x256xf32> to vector<1x256xf32>
    %46 = vector.broadcast %45 : vector<1x256xf32> to vector<3x256xf32>
    %47 = arith.mulf %44, %46 : vector<3x256xf32>
    %48 = vector.extract_strided_slice %2 {offsets = [5, 0, 0], sizes = [1, 16, 3], strides = [1, 1, 1]} : vector<9x16x3xbf16> to vector<1x16x3xbf16>
    %49 = vector.shape_cast %48 : vector<1x16x3xbf16> to vector<16x3xbf16>
    %50 = arith.truncf %47 : vector<3x256xf32> to vector<3x256xbf16>
    %cst_11 = arith.constant dense<0.000000e+00> : vector<16x256xf32>
    %51 = tpu.matmul %49, %50, %cst_11 {dimension_numbers = #tpu.dot_dimension_numbers<[1], [0], [0], [1], [0, 0, 1, 1], [], []>} : vector<16x3xbf16>, vector<3x256xbf16>, vector<16x256xf32> -> vector<16x256xf32>
    %52 = arith.addf %43, %51 : vector<16x256xf32>
    %c241_i32 = arith.constant 241 : i32
    %53 = tpu.dynamic_rotate %1 by %c241_i32 dim 1 : vector<3x256xf32>, i32 -> vector<3x256xf32>
    %54 = vector.extract_strided_slice %3 {offsets = [5, 0], sizes = [1, 256], strides = [1, 1]} : vector<8x256xf32> to vector<1x256xf32>
    %55 = vector.broadcast %54 : vector<1x256xf32> to vector<3x256xf32>
    %56 = arith.mulf %53, %55 : vector<3x256xf32>
    %57 = vector.extract_strided_slice %2 {offsets = [6, 0, 0], sizes = [1, 16, 3], strides = [1, 1, 1]} : vector<9x16x3xbf16> to vector<1x16x3xbf16>
    %58 = vector.shape_cast %57 : vector<1x16x3xbf16> to vector<16x3xbf16>
    %59 = arith.truncf %56 : vector<3x256xf32> to vector<3x256xbf16>
    %cst_12 = arith.constant dense<0.000000e+00> : vector<16x256xf32>
    %60 = tpu.matmul %58, %59, %cst_12 {dimension_numbers = #tpu.dot_dimension_numbers<[1], [0], [0], [1], [0, 0, 1, 1], [], []>} : vector<16x3xbf16>, vector<3x256xbf16>, vector<16x256xf32> -> vector<16x256xf32>
    %61 = arith.addf %52, %60 : vector<16x256xf32>
    %c240_i32 = arith.constant 240 : i32
    %62 = tpu.dynamic_rotate %1 by %c240_i32 dim 1 : vector<3x256xf32>, i32 -> vector<3x256xf32>
    %63 = vector.extract_strided_slice %3 {offsets = [6, 0], sizes = [1, 256], strides = [1, 1]} : vector<8x256xf32> to vector<1x256xf32>
    %64 = vector.broadcast %63 : vector<1x256xf32> to vector<3x256xf32>
    %65 = arith.mulf %62, %64 : vector<3x256xf32>
    %66 = vector.extract_strided_slice %2 {offsets = [7, 0, 0], sizes = [1, 16, 3], strides = [1, 1, 1]} : vector<9x16x3xbf16> to vector<1x16x3xbf16>
    %67 = vector.shape_cast %66 : vector<1x16x3xbf16> to vector<16x3xbf16>
    %68 = arith.truncf %65 : vector<3x256xf32> to vector<3x256xbf16>
    %cst_13 = arith.constant dense<0.000000e+00> : vector<16x256xf32>
    %69 = tpu.matmul %67, %68, %cst_13 {dimension_numbers = #tpu.dot_dimension_numbers<[1], [0], [0], [1], [0, 0, 1, 1], [], []>} : vector<16x3xbf16>, vector<3x256xbf16>, vector<16x256xf32> -> vector<16x256xf32>
    %70 = arith.addf %61, %69 : vector<16x256xf32>
    %c239_i32 = arith.constant 239 : i32
    %71 = tpu.dynamic_rotate %1 by %c239_i32 dim 1 : vector<3x256xf32>, i32 -> vector<3x256xf32>
    %72 = vector.extract_strided_slice %3 {offsets = [7, 0], sizes = [1, 256], strides = [1, 1]} : vector<8x256xf32> to vector<1x256xf32>
    %73 = vector.broadcast %72 : vector<1x256xf32> to vector<3x256xf32>
    %74 = arith.mulf %71, %73 : vector<3x256xf32>
    %75 = vector.extract_strided_slice %2 {offsets = [8, 0, 0], sizes = [1, 16, 3], strides = [1, 1, 1]} : vector<9x16x3xbf16> to vector<1x16x3xbf16>
    %76 = vector.shape_cast %75 : vector<1x16x3xbf16> to vector<16x3xbf16>
    %77 = arith.truncf %74 : vector<3x256xf32> to vector<3x256xbf16>
    %cst_14 = arith.constant dense<0.000000e+00> : vector<16x256xf32>
    %78 = tpu.matmul %76, %77, %cst_14 {dimension_numbers = #tpu.dot_dimension_numbers<[1], [0], [0], [1], [0, 0, 1, 1], [], []>} : vector<16x3xbf16>, vector<3x256xbf16>, vector<16x256xf32> -> vector<16x256xf32>
    %79 = arith.addf %70, %78 : vector<16x256xf32>
    %c0_15 = arith.constant 0 : index
    %c0_16 = arith.constant 0 : index
    %80 = vector.load %arg3[%c0_15, %c0_16] : memref<16x2xf32, #tpu.memory_space<vmem>>, vector<16x2xf32>
    %81 = vector.extract_strided_slice %80 {offsets = [0, 0], sizes = [16, 1], strides = [1, 1]} : vector<16x2xf32> to vector<16x1xf32>
    %82 = vector.broadcast %81 : vector<16x1xf32> to vector<16x256xf32>
    %83 = arith.mulf %79, %82 : vector<16x256xf32>
    %84 = vector.extract_strided_slice %80 {offsets = [0, 1], sizes = [16, 1], strides = [1, 1]} : vector<16x2xf32> to vector<16x1xf32>
    %85 = vector.broadcast %84 : vector<16x1xf32> to vector<16x256xf32>
    %86 = arith.addf %83, %85 : vector<16x256xf32>
    %cst_17 = arith.constant 0.000000e+00 : f32
    %87 = vector.broadcast %cst_17 : f32 to vector<16x256xf32>
    %88 = arith.maximumf %86, %87 : vector<16x256xf32>
    %c0_18 = arith.constant 0 : index
    %c0_19 = arith.constant 0 : index
    %c0_20 = arith.constant 0 : index
    %89 = vector.load %arg5[%c0_18, %c0_19, %c0_20] : memref<1x16x256xf32, #tpu.memory_space<vmem>>, vector<1x16x256xf32>
    %90 = vector.shape_cast %89 : vector<1x16x256xf32> to vector<16x256xf32>
    %91 = vector.shape_cast %88 : vector<16x256xf32> to vector<1x16x256xf32>
    tpu.vector_store %arg5[%c0_18, %c0_19, %c0_20], %91 {strides = array<i32>} : memref<1x16x256xf32, #tpu.memory_space<vmem>>, vector<1x16x256xf32>,
    return
  }
  func.func @transform_0(%arg0: i32) -> (i32, i32, i32) {
    %c0_i32 = arith.constant 0 : i32
    %c0_i32_0 = arith.constant 0 : i32
    %c0_i32_1 = arith.constant 0 : i32
    return %arg0, %c0_i32, %c0_i32_0 : i32, i32, i32
  }
  func.func @transform_1(%arg0: i32) -> (i32, i32, i32) {
    %c0_i32 = arith.constant 0 : i32
    %c0_i32_0 = arith.constant 0 : i32
    %c0_i32_1 = arith.constant 0 : i32
    %c0_i32_2 = arith.constant 0 : i32
    return %c0_i32, %c0_i32_0, %c0_i32_1 : i32, i32, i32
  }
  func.func @transform_2(%arg0: i32) -> (i32, i32) {
    %c0_i32 = arith.constant 0 : i32
    %c0_i32_0 = arith.constant 0 : i32
    %c0_i32_1 = arith.constant 0 : i32
    return %c0_i32, %c0_i32_0 : i32, i32
  }
  func.func @transform_3(%arg0: i32) -> (i32, i32) {
    %c0_i32 = arith.constant 0 : i32
    %c0_i32_0 = arith.constant 0 : i32
    %c0_i32_1 = arith.constant 0 : i32
    return %c0_i32, %c0_i32_0 : i32, i32
  }
  func.func @transform_4(%arg0: i32) -> (i32, i32, i32) {
    %c0_i32 = arith.constant 0 : i32
    %c0_i32_0 = arith.constant 0 : i32
    %c0_i32_1 = arith.constant 0 : i32
    return %arg0, %c0_i32, %c0_i32_0 : i32, i32, i32
  }
}

</mosaic_0001>

<bundles_post_ra>
// kernel: tpu_custom_call.1
= control target key start
LH: loop header
LB: loop body
LE: loop exit
PB: predicated region body
PF: predicated region fallthrough
CT: control target
= control target key end

     0   :  { %9 = vsyncpa [#allocation3], 0  ;;  %s1341_s0 = inlined_call_operand.vmem [shape: f32[3,3,256], index: 0, kind: input, shape index: {}]   ;;  %s1342_s1 = inlined_call_operand.vmem [shape: bf16[9,16,3], index: 1, kind: input, shape index: {}]   ;;  %s1343_s2 = inlined_call_operand.vmem [shape: f32[16,2], index: 2, kind: input, shape index: {}]   ;;  %s1344_s3 = inlined_call_operand.vmem [shape: f32[8,256], index: 3, kind: input, shape index: {}]   ;;  %s1345_s4 = inlined_call_operand.hbm [shape: f32[3,16,256], index: 4, kind: output, shape index: {}]  }
   0x1   :  { %11 = vsyncpa [#allocation3 + $0x1], 0  ;;  %s1130_s15 = smov 0   ;;  %s1132_s16 = smov 0  }
   0x2   :  { %s1134_s17 = smov 0   ;;  %s1136_s18 = smov 0  }
   0x3 LB: > { %s1151_s19 = sadd.s32 4294967295, %s1091_s18   ;;  %s897_s20 = sadd.s32 4294967294, %s1091_s18   ;;  %s1091_s18 = sphi %s1136_s18, %s1351_s18   ;;  %s1087_s17 = sphi %s1134_s17, %s1350_s17   ;;  %s1083_s16 = sphi %s1132_s16, %s1349_s16   ;;  %s1079_s15 = sphi %s1130_s15, %s1348_s15  }
   0x4   : > { %s1155_s21 = sadd.s32 1, %s1091_s18   ;;  %s113_s22 = sadd.s32 1, %s1087_s17 }
   0x5   : > { %s110_s23 = ssub.s32 %s1091_s18, %s1155_s21  ;;  %p123_p0 = scmp.ne.s32.totalorder %s1087_s17, %s1083_s16 }
   0x6   : > { %p111_p1 = scmp.eq.s32.totalorder %s110_s23, 0  ;;  %p124_p2 = scmp.eq.s32.totalorder %s1151_s19, 2 }
   0x7   : > { %p129_p3 = scmp.ne.s32.totalorder %s1083_s16, %s1079_s15  ;;  %p130_p4 = scmp.eq.s32.totalorder %s897_s20, 2 }
   0x8   : > { %s1166_s24 = scalar_select %p111_p1, %s1087_s17, %s113_s22  }
   0x9   : > { %p1168_p5 = por %p124_p2, %p123_p0  ;;  %p1172_p6 = por %p130_p4, %p129_p3 }
   0xa   : > { %p900_p7 = scmp.ge.s32.totalorder %s1091_s18, 1  ;;  %p165_p8 = scmp.lt.s32.totalorder %s1091_s18, 4 }
   0xc   : > { %p166_p9 = pnand %p900_p7, %p165_p8 }
   0xd   : > { %p191_p10 = scmp.lt.s32.totalorder (!%p166_p9), %s1151_s19, 2  ;;  %s1093_s6 = smov (!%p166_p9), 17  }
   0xe   : > { %169 = sbr.rel (%p166_p9) target bundleno = 384 (0x180), region = 36  ;;  %s1094_s7 = smov (!%p166_p9), 16  }
   0xf   : > { %s1095_s8 = smov (!%p166_p9), 15   ;;  %s1096_s9 = smov (!%p166_p9), 1  }
  0x10   : > { %s1097_s10 = smov (!%p166_p9), 127   ;;  %s1098_s11 = smov (!%p166_p9), 113  }
  0x11   : > { %s1099_s12 = smov (!%p166_p9), 112   ;;  %s1100_s13 = smov (!%p166_p9), 111  }
  0x12   : > { %s1049_s30 = scalar_lea.hbm (!%p166_p9), %s1345_s4, 96 }
  0x13   : > { %s192_s27 = scalar_select %p191_p10, %s1151_s19, 2  ;;  %v228_v20 = vlaneseq  ;;  %v1194_v23 = vld [vmem:[%s1344_s3] sm:$0xff]  ;;  %v1199_v24 = vld [vmem:[%s1344_s3 + $0x8] sm:$0xff]  ;;  %vm266_vm0 = vcmask 1040384   ;;  %vm267_vm3 = vcmask 1041408   ;;  %v1101_v30 = vmov 65535  }
  0x14   : > { %v233_v25 = vperm.slane %v1194_v23, 0  ;;  %v234_v26 = vperm.slane %v1199_v24, 0  ;;  %v268_v31 = vsel %vm266_vm0, 4294967295, %v1101_v30  ;;  %v358_v34 = vperm.slane %v1194_v23, 2  ;;  %v964_v49 = vld [vmem:[%s1342_s1] sm:$0xff] }
  0x15   : > { %s963_s28 = sshll.u32 %s192_s27, 3  ;;  %v1189_v22 = vand.u32 127, %v228_v20  ;;  %v359_v35 = vperm.slane %v1199_v24, 2  ;;  %v1207_v40 = vsel %vm267_vm3, %v268_v31, 0  ;;  %v251_v47 = vperm.slane %v1194_v23, 1  ;;  %v966_v20 = vld [vmem:[%s1342_s1 + $0x10] sm:$0xff] }
  0x16   : > { %s195_s5 = scalar_lea.vmem %s1341_s0, %s963_s28  ;;  %v252_v48 = vperm.slane %v1199_v24, 1  ;;  %vm262_vm5 = vcmask 23552  }
  0x17   : > { %v197_v0 = vld [vmem:[%s195_s5] sm:$0x77]  ;;  %vm230_vm1 = vcmp.lt.s32.totalorder %v1189_v22, 17  ;;  %vm355_vm2 = vcmp.lt.s32.totalorder %v1189_v22, 15  ;;  %vm248_vm4 = vcmp.lt.s32.totalorder %v1189_v22, 16  ;;  %vm419_vm6 = vcmp.lt.s32.totalorder %v1189_v22, 1 }
  0x18   : > { %219 = vst [vmem:[#allocation1] ss:$2 sm:$0xff] %v197_v0  ;;  %vm536_vm7 = vcmp.lt.s32.totalorder %v1189_v22, 127  ;;  %vm600_vm8 = vcmp.lt.s32.totalorder %v1189_v22, 113  ;;  %vm664_vm9 = vcmp.lt.s32.totalorder %v1189_v22, 112  ;;  %vm728_vm10 = vcmp.lt.s32.totalorder %v1189_v22, 111 }
  0x19   : > { %v972_v22 = vld [vmem:[%s1342_s1 + $0x40] sm:$0xff] }
  0x1f   : > { %v220_v1 = vld.sshfl [vmem:[#allocation1] sm:$0xff pattern:$0x75316420]  ;;  %v221_v2 = vld.sshfl [vmem:[#allocation1 + $0x8] sm:$0xff pattern:$0x75316420] }
  0x20   : > { %224 = vrot.lane.b32.xlu1 %v220_v1, %s1093_s6  ;;  %239 = vst [vmem:[#allocation1] ss:$2 sm:$0xff] %v197_v0  ;;  %v422_v1 = vperm.slane %v1194_v23, 3 }
  0x27   : > { %v240_v3 = vld.sshfl [vmem:[#allocation1] sm:$0xff pattern:$0x75316420]  ;;  %v241_v4 = vld.sshfl [vmem:[#allocation1 + $0x8] sm:$0xff pattern:$0x75316420] }
  0x28   : > { %244 = vrot.lane.b32.xlu0 %v240_v3, %s1094_s7  ;;  %226 = vrot.lane.b32.xlu1 %v221_v2, %s1093_s6  ;;  %346 = vst [vmem:[#allocation1] ss:$2 sm:$0xff] %v197_v0  ;;  %v423_v2 = vperm.slane %v1199_v24, 3  ;;  %v965_v3 = vld [vmem:[%s1342_s1 + $0x8] sm:$0xff] }
  0x2f   : > { %v347_v5 = vld.sshfl [vmem:[#allocation1] sm:$0xff pattern:$0x75316420]  ;;  %v348_v6 = vld.sshfl [vmem:[#allocation1 + $0x8] sm:$0xff pattern:$0x75316420] }
  0x30   : > { %246 = vrot.lane.b32.xlu0 %v241_v4, %s1094_s7  ;;  %351 = vrot.lane.b32.xlu2 %v347_v5, %s1095_s8  ;;  %410 = vst [vmem:[#allocation1] ss:$2 sm:$0xff] %v197_v0 }
  0x37   : > { %v412_v7 = vld.sshfl [vmem:[#allocation1 + $0x8] sm:$0xff pattern:$0x75316420]  ;;  %v411_v8 = vld.sshfl [vmem:[#allocation1] sm:$0xff pattern:$0x75316420] }
  0x38   : > { %417 = vrot.lane.b32.xlu1 %v412_v7, %s1096_s9  ;;  %415 = vrot.lane.b32.xlu0 %v411_v8, %s1096_s9  ;;  %474 = vst [vmem:[#allocation1] ss:$2 sm:$0xff] %v197_v0 }
  0x39   : > { %353 = vrot.lane.b32.xlu2 %v348_v6, %s1095_s8  ;;  %s188_s8 = sand.u32 1, %s1083_s16  }
  0x3a   : > { %s901_s9 = sshll.u32 %s188_s8, 5  ;;  %s820_s22 = scalar_lea.sflag [#allocation3], %s188_s8 }
  0x3f   : > { %v1185_v9 = vld.sshfl [vmem:[#allocation1] sm:$0xff pattern:$0x75316420]  ;;  %v1187_v10 = vld.sshfl [vmem:[#allocation1 + $0x8] sm:$0xff pattern:$0x75316420] }
  0x40   : > { %527 = vst [vmem:[#allocation1] ss:$2 sm:$0xff] %v197_v0  ;;  %v480_v59 = vpack.c.bf16 %v1187_v10, %v1187_v10  ;;  %v479_v60 = vpack.c.bf16 %v1185_v9, %v1185_v9 }
  0x42   : > { %v493_v6 = vand.u32 %v480_v59, %v1207_v40  ;;  %v490_v7 = vand.u32 %v479_v60, %v1207_v40  ;;  %v1102_v59 = vmov 0   ;;  %v1103_v60 = vmov 1  }
  0x43   : > { %1025 = vset.pattern.permute.xlu1 %v1102_v59  ;;  %1027 = vset.pattern.permute.xlu0 %v1103_v60 }
  0x44   : > { %1026 = vset.pattern.permute.xlu2 %v1102_v59 }
  0x47   : > { %v529_v11 = vld.sshfl [vmem:[#allocation1 + $0x8] sm:$0xff pattern:$0x75316420]  ;;  %v528_v12 = vld.sshfl [vmem:[#allocation1] sm:$0xff pattern:$0x75316420] }
  0x48   : > { %534 = vrot.lane.b32.xlu0 %v529_v11, %s1097_s10  ;;  %591 = vst [vmem:[#allocation1] ss:$2 sm:$0xff] %v197_v0  ;;  %532 = vrot.lane.b32.xlu2 %v528_v12, %s1097_s10  ;;  %s973_s10 = sshll.u32 %s1151_s19, 5 }
  0x49   : > { %s831_s14 = scalar_lea.hbm %s1345_s4, %s973_s10 }
  0x4a   : > { %s834_s19 = sshll.u32 %s831_s14, 4  ;;  %s835_s19 = int_to_ptr.hbm [resolvable:$true] %s834_s19 }
  0x4b   : > { %s1043_s23 = sshra.s32 %s835_s19, 4  ;;  %s1044_s23 = int_to_ptr.hbm [resolvable:$true] %s1043_s23 }
  0x4c   : > { %s1045_s27 = scalar_lea.hbm %s1044_s23, 32  ;;  %p1050_p0 = scmp.lt.s32.totalorder %s1044_s23, %s1345_s4 }
  0x4d   : > { %p1046_p11 = scmp.ne.s32.totalorder %s1044_s23, %s1045_s27  ;;  %p1051_p1 = scmp.lt.s32.totalorder %s1049_s30, %s1045_s27 }
  0x4f   : > { %v592_v13 = vld.sshfl [vmem:[#allocation1] sm:$0xff pattern:$0x75316420]  ;;  %v593_v14 = vld.sshfl [vmem:[#allocation1 + $0x8] sm:$0xff pattern:$0x75316420]  ;;  %p1047_p12 = pnand %p1046_p11, %p1168_p5  ;;  %p1052_p2 = por %p1051_p1, %p1050_p0 }
  0x50   : > { %596 = vrot.lane.b32.xlu1 %v592_v13, %s1098_s11  ;;  %655 = vst [vmem:[#allocation1] ss:$2 sm:$0xff] %v197_v0  ;;  %598 = vrot.lane.b32.xlu2 %v593_v14, %s1098_s11  ;;  %s190_s11 = scalar_lea.vmem [#allocation2], %s901_s9 }
  0x51   : > { %s832_s20 = sshll.u32 %s190_s11, 4  ;;  %p1048_p13 = pneg %p1047_p12  ;;  %s833_s20 = int_to_ptr.vmem [resolvable:$true] %s832_s20 }
  0x53   : > { %p1053_p3 = pnand %p1052_p2, %p1048_p13 }
  0x57   : > { %v657_v15 = vld.sshfl [vmem:[#allocation1 + $0x8] sm:$0xff pattern:$0x75316420]  ;;  %v656_v16 = vld.sshfl [vmem:[#allocation1] sm:$0xff pattern:$0x75316420] }
  0x58   : > { %662 = vrot.lane.b32.xlu1 %v657_v15, %s1099_s12  ;;  %660 = vrot.lane.b32.xlu0 %v656_v16, %s1099_s12  ;;  %719 = vst [vmem:[#allocation1] ss:$2 sm:$0xff] %v197_v0  ;;  %v967_v16 = vld [vmem:[%s1342_s1 + $0x18] sm:$0xff] }
  0x5f   : > { %v721_v17 = vld.sshfl [vmem:[#allocation1 + $0x8] sm:$0xff pattern:$0x75316420]  ;;  %v720_v18 = vld.sshfl [vmem:[#allocation1] sm:$0xff pattern:$0x75316420] }
  0x60   : > { %726 = vrot.lane.b32.xlu0 %v721_v17, %s1100_s13  ;;  %724 = vrot.lane.b32.xlu2 %v720_v18, %s1100_s13  ;;  %v539_v17 = vperm.slane %v1194_v23, 4  ;;  %v540_v18 = vperm.slane %v1199_v24, 4 }
  0x8a   : > { %v352_v19 = vpop.permute.xlu2 %351 }
  0x92   : > { %v225_v21 = vpop.permute.xlu1 %224 }
  0x93   : > { %v354_v27 = vpop.permute.xlu2 %353 }
  0x94   : > { %v356_v36 = vsel %vm355_vm2, %v352_v19, %v354_v27  ;;  %v357_v37 = vsel %vm355_vm2, %v354_v27, %v352_v19 }
  0x95   : > { %v360_v43 = vmul.f32 %v358_v34, %v357_v37  ;;  %v361_v44 = vmul.f32 %v359_v35, %v356_v36  ;;  %v603_v34 = vperm.slane %v1194_v23, 5  ;;  %v604_v35 = vperm.slane %v1199_v24, 5  ;;  %v969_v36 = vld [vmem:[%s1342_s1 + $0x28] sm:$0xff] }
  0x97   : > { %v362_v51 = vpack.c.bf16 %v360_v43, %v360_v43  ;;  %v363_v52 = vpack.c.bf16 %v361_v44, %v361_v44 }
  0x99   : > { %v373_v61 = vand.u32 %v362_v51, %v1207_v40  ;;  %v376_v62 = vand.u32 %v363_v52, %v1207_v40 }
  0x9a   : > { %v245_v28 = vpop.permute.xlu0 %244  ;;  %v227_v29 = vpop.permute.xlu1 %226 }
  0x9b   : > { %v231_v32 = vsel %vm230_vm1, %v225_v21, %v227_v29  ;;  %v232_v33 = vsel %vm230_vm1, %v227_v29, %v225_v21 }
  0x9c   : > { %v235_v38 = vmul.f32 %v233_v25, %v232_v33  ;;  %v236_v39 = vmul.f32 %v234_v26, %v231_v32 }
  0x9e   : > { %v237_v41 = vpack.c.bf16 %v235_v38, %v235_v38  ;;  %v238_v42 = vpack.c.bf16 %v236_v39, %v236_v39 }
  0xa0   : > { %v313_v45 = vand.u32 %v1207_v40, %v237_v41  ;;  %v316_v46 = vand.u32 %v1207_v40, %v238_v42 }
  0xa2   : > { %v247_v50 = vpop.permute.xlu0 %246  ;;  %325 = vmatpush.bf16.msra.mxu2 %v313_v45  ;;  %339 = vmatpush.bf16.msra.mxu3 %v316_v46  ;;  %v533_v19 = vpop.permute.xlu2 %532 }
  0xa3   : > { %v249_v53 = vsel %vm248_vm4, %v245_v28, %v247_v50  ;;  %v250_v54 = vsel %vm248_vm4, %v247_v50, %v245_v28 }
  0xa4   : > { %v253_v55 = vmul.f32 %v251_v47, %v250_v54  ;;  %v254_v56 = vmul.f32 %v252_v48, %v249_v53  ;;  %v667_v47 = vperm.slane %v1194_v23, 6  ;;  %v668_v48 = vperm.slane %v1199_v24, 6 }
  0xa5   : > { %914 = vmatmul.msk.bf16.vlgmr.msra.gmra.mxu2 %vm262_vm5, %v964_v49  ;;  %915 = vmatmul.msk.bf16.vlgmr.msra.gmra.mxu3 %vm262_vm5, %v964_v49  ;;  %v968_v49 = vld [vmem:[%s1342_s1 + $0x20] sm:$0xff] }
  0xa6   : > { %v255_v57 = vpack.c.bf16 %v253_v55, %v253_v55  ;;  %v256_v58 = vpack.c.bf16 %v254_v56, %v254_v56  ;;  %v783_v56 = vld [vmem:[%s1343_s2] sm:$0xff] }
  0xa7   : > { %787 = vperm.xlu1 %1025, %v783_v56   ;;  %800 = vperm.xlu0 %1027, %v783_v56  }
  0xa8   : > { %v271_v63 = vand.u32 %v1207_v40, %v255_v57  ;;  %v274_v0 = vand.u32 %v1207_v40, %v256_v58 }
  0xaa   : > { %283 = vmatpush.bf16.msra.mxu0 %v271_v63  ;;  %297 = vmatpush.bf16.msra.mxu1 %v274_v0  ;;  %v418_v4 = vpop.permute.xlu1 %417  ;;  %v416_v5 = vpop.permute.xlu0 %415  ;;  %v731_v63 = vperm.slane %v1194_v23, 7  ;;  %v732_v0 = vperm.slane %v1199_v24, 7 }
  0xab   : > { %v420_v8 = vsel %vm419_vm6, %v416_v5, %v418_v4  ;;  %v421_v9 = vsel %vm419_vm6, %v418_v4, %v416_v5  ;;  %v599_v33 = vpop.permute.xlu2 %598 }
  0xac   : > { %v424_v10 = vmul.f32 %v422_v1, %v421_v9  ;;  %v425_v11 = vmul.f32 %v423_v2, %v420_v8  ;;  %v784_v2 = vld [vmem:[%s1343_s2 + $0x8] sm:$0xff] }
  0xad   : > { %908 = vmatmul.msk.bf16.vlgmr.msra.gmra.mxu0 %vm262_vm5, %v965_v3  ;;  %909 = vmatmul.msk.bf16.vlgmr.msra.gmra.mxu1 %vm262_vm5, %v965_v3  ;;  %v971_v3 = vld [vmem:[%s1342_s1 + $0x38] sm:$0xff] }
  0xae   : > { %385 = vmatpush.bf16.msrb.mxu0 %v373_v61  ;;  %399 = vmatpush.bf16.msrb.mxu1 %v376_v62  ;;  %v426_v12 = vpack.c.bf16 %v424_v10, %v424_v10  ;;  %v427_v13 = vpack.c.bf16 %v425_v11, %v425_v11  ;;  %v970_v11 = vld [vmem:[%s1342_s1 + $0x30] sm:$0xff] }
  0xaf   : > { %792 = vperm.xlu2 %1026, %v784_v2   ;;  %1028 = vset.pattern.permute.xlu1 %v1103_v60 }
  0xb0   : > { %v437_v14 = vand.u32 %v426_v12, %v1207_v40  ;;  %v440_v15 = vand.u32 %v427_v13, %v1207_v40  ;;  %804 = vperm.xlu1 %1028, %v784_v2  }
  0xb2   : > { %516 = vmatpush.bf16.msra.mxu1 %v493_v6  ;;  %502 = vmatpush.bf16.msra.mxu0 %v490_v7 }
  0xb3   : > { %449 = vmatpush.bf16.msrb.mxu2 %v437_v14  ;;  %463 = vmatpush.bf16.msrb.mxu3 %v440_v15 }
  0xb6   : > { %926 = vmatmul.msk.bf16.vlgmr.msrb.gmra.mxu2 %vm262_vm5, %v967_v16  ;;  %927 = vmatmul.msk.bf16.vlgmr.msrb.gmra.mxu3 %vm262_vm5, %v967_v16 }
  0xba   : > { %v535_v21 = vpop.permute.xlu0 %534  ;;  %v725_v1 = vpop.permute.xlu2 %724 }
  0xbb   : > { %v537_v25 = vsel %vm536_vm7, %v533_v19, %v535_v21  ;;  %v538_v26 = vsel %vm536_vm7, %v535_v21, %v533_v19 }
  0xbc   : > { %v541_v27 = vmul.f32 %v539_v17, %v537_v25  ;;  %v542_v28 = vmul.f32 %v540_v18, %v538_v26 }
  0xbd   : > { %920 = vmatmul.msk.bf16.vlgmr.msrb.gmra.mxu0 %vm262_vm5, %v966_v20  ;;  %921 = vmatmul.msk.bf16.vlgmr.msrb.gmra.mxu1 %vm262_vm5, %v966_v20 }
  0xbe   : > { %v543_v29 = vpack.c.bf16 %v541_v27, %v541_v27  ;;  %v544_v30 = vpack.c.bf16 %v542_v28, %v542_v28 }
  0xc0   : > { %v554_v31 = vand.u32 %v543_v29, %v1207_v40  ;;  %v557_v32 = vand.u32 %v544_v30, %v1207_v40 }
  0xc2   : > { %566 = vmatpush.bf16.msra.mxu2 %v554_v31  ;;  %580 = vmatpush.bf16.msra.mxu3 %v557_v32  ;;  %v597_v37 = vpop.permute.xlu1 %596 }
  0xc3   : > { %v601_v38 = vsel %vm600_vm8, %v597_v37, %v599_v33  ;;  %v602_v39 = vsel %vm600_vm8, %v599_v33, %v597_v37 }
  0xc4   : > { %v605_v41 = vmul.f32 %v603_v34, %v601_v38  ;;  %v606_v42 = vmul.f32 %v604_v35, %v602_v39 }
  0xc6   : > { %938 = vmatmul.msk.bf16.vlgmr.msra.gmra.mxu2 %vm262_vm5, %v969_v36  ;;  %939 = vmatmul.msk.bf16.vlgmr.msra.gmra.mxu3 %vm262_vm5, %v969_v36  ;;  %v607_v43 = vpack.c.bf16 %v605_v41, %v605_v41  ;;  %v608_v44 = vpack.c.bf16 %v606_v42, %v606_v42 }
  0xc8   : > { %v618_v45 = vand.u32 %v607_v43, %v1207_v40  ;;  %v621_v46 = vand.u32 %v608_v44, %v1207_v40 }
  0xca   : > { %644 = vmatpush.bf16.msrb.mxu1 %v621_v46  ;;  %v663_v50 = vpop.permute.xlu1 %662  ;;  %v661_v51 = vpop.permute.xlu0 %660  ;;  %630 = vmatpush.bf16.msrb.mxu0 %v618_v45 }
  0xcb   : > { %v665_v52 = vsel %vm664_vm9, %v661_v51, %v663_v50  ;;  %v666_v53 = vsel %vm664_vm9, %v663_v50, %v661_v51 }
  0xcc   : > { %v669_v54 = vmul.f32 %v667_v47, %v665_v52  ;;  %v670_v55 = vmul.f32 %v668_v48, %v666_v53 }
  0xcd   : > { %933 = vmatmul.msk.bf16.vlgmr.msra.gmra.mxu1 %vm262_vm5, %v968_v49  ;;  %932 = vmatmul.msk.bf16.vlgmr.msra.gmra.mxu0 %vm262_vm5, %v968_v49 }
  0xce   : > { %v671_v57 = vpack.c.bf16 %v669_v54, %v669_v54  ;;  %v672_v58 = vpack.c.bf16 %v670_v55, %v670_v55 }
  0xd0   : > { %v682_v61 = vand.u32 %v671_v57, %v1207_v40  ;;  %v685_v62 = vand.u32 %v672_v58, %v1207_v40 }
  0xd2   : > { %694 = vmatpush.bf16.msrb.mxu2 %v682_v61  ;;  %708 = vmatpush.bf16.msrb.mxu3 %v685_v62  ;;  %v727_v4 = vpop.permute.xlu0 %726 }
  0xd3   : > { %v729_v5 = vsel %vm728_vm10, %v725_v1, %v727_v4  ;;  %v730_v23 = vsel %vm728_vm10, %v727_v4, %v725_v1 }
  0xd4   : > { %v733_v24 = vmul.f32 %v731_v63, %v729_v5  ;;  %v734_v6 = vmul.f32 %v732_v0, %v730_v23 }
  0xd6   : > { %950 = vmatmul.msk.bf16.vlgmr.msrb.gmra.mxu2 %vm262_vm5, %v971_v3  ;;  %951 = vmatmul.msk.bf16.vlgmr.msrb.gmra.mxu3 %vm262_vm5, %v971_v3  ;;  %v735_v7 = vpack.c.bf16 %v733_v24, %v733_v24  ;;  %v736_v8 = vpack.c.bf16 %v734_v6, %v734_v6 }
  0xd8   : > { %v746_v9 = vand.u32 %v735_v7, %v1207_v40  ;;  %v749_v10 = vand.u32 %v736_v8, %v1207_v40 }
  0xda   : > { %758 = vmatpush.bf16.msra.mxu0 %v746_v9  ;;  %772 = vmatpush.bf16.msra.mxu1 %v749_v10 }
  0xdd   : > { %944 = vmatmul.msk.bf16.vlgmr.msrb.gmra.mxu0 %vm262_vm5, %v970_v11  ;;  %945 = vmatmul.msk.bf16.vlgmr.msrb.gmra.mxu1 %vm262_vm5, %v970_v11 }
  0xed   : > { %956 = vmatmul.msk.bf16.vlgmr.msra.gmra.mxu0 %vm262_vm5, %v972_v22  ;;  %957 = vmatmul.msk.bf16.vlgmr.msra.gmra.mxu1 %vm262_vm5, %v972_v22 }
 0x119   : > { %v788_v3 = vpop.permute.xlu1 %787  ;;  %v801_v8 = vpop.permute.xlu0 %800 }
 0x128   : > { %v327_v40 = vpop.f32.mrf.mxu2  ;;  %v341_v12 = vpop.f32.mrf.mxu3 }
 0x12a   : > { %v285_v13 = vpop.f32.mrf.mxu0  ;;  %v299_v14 = vpop.f32.mrf.mxu1 }
 0x12b   : > { %v328_v36 = vadd.f32 %v327_v40, %v285_v13  ;;  %v342_v37 = vadd.f32 %v341_v12, %v299_v14 }
 0x130   : > { %v329_v17 = vpop.f32.mrf.mxu2  ;;  %v343_v18 = vpop.f32.mrf.mxu3 }
 0x132   : > { %v287_v15 = vpop.f32.mrf.mxu0  ;;  %v301_v16 = vpop.f32.mrf.mxu1 }
 0x133   : > { %v330_v47 = vadd.f32 %v329_v17, %v287_v15  ;;  %v344_v48 = vadd.f32 %v343_v18, %v301_v16 }
 0x139   : > { %v451_v21 = vpop.f32.mrf.mxu2  ;;  %v465_v25 = vpop.f32.mrf.mxu3 }
 0x13a   : > { %v387_v19 = vpop.f32.mrf.mxu0  ;;  %v401_v20 = vpop.f32.mrf.mxu1 }
 0x13b   : > { %v406_v38 = vadd.f32 %v387_v19, %v328_v36  ;;  %v407_v39 = vadd.f32 %v401_v20, %v342_v37  ;;  %v793_v19 = vpop.permute.xlu2 %792 }
 0x13d   : > { %v470_v45 = vadd.f32 %v451_v21, %v406_v38  ;;  %v471_v46 = vadd.f32 %v465_v25, %v407_v39 }
 0x141   : > { %v453_v28 = vpop.f32.mrf.mxu2  ;;  %v467_v29 = vpop.f32.mrf.mxu3 }
 0x142   : > { %v389_v26 = vpop.f32.mrf.mxu0  ;;  %v403_v27 = vpop.f32.mrf.mxu1 }
 0x143   : > { %v408_v51 = vadd.f32 %v389_v26, %v330_v47  ;;  %v409_v52 = vadd.f32 %v403_v27, %v344_v48  ;;  %v805_v27 = vpop.permute.xlu1 %804 }
 0x145   : > { %v472_v59 = vadd.f32 %v453_v28, %v408_v51  ;;  %v473_v60 = vadd.f32 %v467_v29, %v409_v52 }
 0x149   : > { %v568_v32 = vpop.f32.mrf.mxu2  ;;  %v582_v33 = vpop.f32.mrf.mxu3 }
 0x14a   : > { %v504_v30 = vpop.f32.mrf.mxu0  ;;  %v518_v31 = vpop.f32.mrf.mxu1 }
 0x14b   : > { %v523_v49 = vadd.f32 %v504_v30, %v470_v45  ;;  %v524_v50 = vadd.f32 %v518_v31, %v471_v46 }
 0x14d   : > { %v587_v55 = vadd.f32 %v568_v32, %v523_v49  ;;  %v588_v56 = vadd.f32 %v582_v33, %v524_v50 }
 0x151   : > { %v570_v41 = vpop.f32.mrf.mxu2  ;;  %v584_v42 = vpop.f32.mrf.mxu3 }
 0x152   : > { %v506_v34 = vpop.f32.mrf.mxu0  ;;  %v520_v35 = vpop.f32.mrf.mxu1 }
 0x153   : > { %v525_v63 = vadd.f32 %v506_v34, %v472_v59  ;;  %v526_v0 = vadd.f32 %v520_v35, %v473_v60 }
 0x155   : > { %v589_v23 = vadd.f32 %v570_v41, %v525_v63  ;;  %v590_v24 = vadd.f32 %v584_v42, %v526_v0 }
 0x159   : > { %v696_v57 = vpop.f32.mrf.mxu2  ;;  %v710_v58 = vpop.f32.mrf.mxu3 }
 0x15a   : > { %v632_v43 = vpop.f32.mrf.mxu0  ;;  %v646_v44 = vpop.f32.mrf.mxu1 }
 0x15b   : > { %v651_v61 = vadd.f32 %v632_v43, %v587_v55  ;;  %v652_v62 = vadd.f32 %v646_v44, %v588_v56 }
 0x15d   : > { %v715_v1 = vadd.f32 %v696_v57, %v651_v61  ;;  %v716_v2 = vadd.f32 %v710_v58, %v652_v62 }
 0x161   : > { %v698_v40 = vpop.f32.mrf.mxu2  ;;  %v712_v12 = vpop.f32.mrf.mxu3 }
 0x162   : > { %v634_v53 = vpop.f32.mrf.mxu0  ;;  %v648_v54 = vpop.f32.mrf.mxu1 }
 0x163   : > { %v653_v9 = vadd.f32 %v634_v53, %v589_v23  ;;  %v654_v10 = vadd.f32 %v648_v54, %v590_v24 }
 0x165   : > { %v717_v15 = vadd.f32 %v698_v40, %v653_v9  ;;  %v718_v16 = vadd.f32 %v712_v12, %v654_v10 }
 0x16a   : > { %v760_v4 = vpop.f32.mrf.mxu0  ;;  %v774_v5 = vpop.f32.mrf.mxu1 }
 0x16b   : > { %v779_v6 = vadd.f32 %v760_v4, %v715_v1  ;;  %v780_v7 = vadd.f32 %v774_v5, %v716_v2 }
 0x16d   : > { %v795_v11 = vmul.f32 %v788_v3, %v779_v6  ;;  %v796_v22 = vmul.f32 %v788_v3, %v780_v7 }
 0x16f   : > { %v807_v13 = vadd.f32 %v801_v8, %v795_v11  ;;  %v808_v14 = vadd.f32 %v801_v8, %v796_v22 }
 0x171   : > { %v811_v17 = vmax.f32 %v807_v13, 0.0  ;;  %v812_v18 = vmax.f32 %v808_v14, 0.0 }
 0x172   : > { %v762_v20 = vpop.f32.mrf.mxu0  ;;  %v776_v21 = vpop.f32.mrf.mxu1 }
 0x173   : > { %815 = vst [vmem:[%s190_s11] sm:$0xff] %v811_v17  ;;  %v781_v25 = vadd.f32 %v762_v20, %v717_v15  ;;  %v782_v26 = vadd.f32 %v776_v21, %v718_v16 }
 0x174   : > { %816 = vst [vmem:[%s190_s11 + $0x8] sm:$0xff] %v812_v18 }
 0x175   : > { %v797_v28 = vmul.f32 %v793_v19, %v781_v25  ;;  %v798_v29 = vmul.f32 %v793_v19, %v782_v26 }
 0x177   : > { %v809_v30 = vadd.f32 %v805_v27, %v797_v28  ;;  %v810_v31 = vadd.f32 %v805_v27, %v798_v29 }
 0x179   : > { %v813_v32 = vmax.f32 %v809_v30, 0.0  ;;  %v814_v33 = vmax.f32 %v810_v31, 0.0 }
 0x17b   : > { %817 = vst [vmem:[%s190_s11 + $0x10] sm:$0xff] %v813_v32 }
 0x17c   : > { %818 = vst [vmem:[%s190_s11 + $0x18] sm:$0xff] %v814_v33 }
 0x17d   : > { %1056 = shalt.err (!%p1053_p3)
}
 0x17e   : > { %s1104_s8 = smov 256  }
 0x17f   : > { %974 = dma.vmem_to_hbm [thread:$0]  (%p1168_p5), %s833_s20, 512, %s835_s19, %s820_s22, %s1104_s8, %s1104_s8, %s1094_s7  }
 0x180 PF: > { %p980_p4 = scmp.ge.s32.totalorder %s1091_s18, 2  ;;  %s849_s9 = sand.u32 1, %s1079_s15  }
 0x181   : > { %s850_s10 = scalar_lea.sflag [#allocation3], %s849_s9 }
 0x182   : > { %p977_p7 = pnand %p980_p4, %p1172_p6 }
 0x184   : > { %p978_p8 = pneg %p977_p7 }
 0x186   : > { %1074 = dma.done.wait (%p978_p8), %s850_s10, 512  }
 0x187   : > { %1076 = vsyncadd (%p978_p8), %s850_s10, 4294966784  ;;  %p14_p9 = scmp.ge.s32.totalorder %s1155_s21, 5   ;;  %s1348_s15 = smov %s1083_s16 }
 0x188   : > { %s1349_s16 = smov %s1087_s17  ;;  %s1350_s17 = smov %s1166_s24 }
 0x189   : > { %s1351_s18 = smov %s1155_s21  ;;  %16 = sbr.rel (!%p14_p9) target bundleno = 3 (0x3), region = 71 }
 0x18e   :  { %856 = vsyncpa [#allocation3], 1 }
 0x18f   :  { %858 = vsyncpa [#allocation3 + $0x1], 1 }

</bundles_post_ra>
